<compile_context>
chip_gen: v7x
topology: tpu7x:2x2x1
jax: 0.10.0
libtpu: 0.0.40
codegen_flags: <defaults>
</compile_context>

<pallas_src>
import functools

import jax
import jax.numpy as jnp
from jax.experimental import pallas as pl
from jax.experimental.pallas import tpu as pltpu

_LANE = 128
_SUBLANE = 8


def _round_up(x, m):
    return ((x + m - 1) // m) * m


def _l2norm(x, axis=-1, eps=1e-12):
    return x * jax.lax.rsqrt(jnp.sum(x * x, axis=axis, keepdims=True) + eps)


def _vqvae_kernel(patches_ref,            # (TM, CPPp)  bf16   token block
                  w_enc_ref, b_enc_ref,   # (CPPp, Ep)  bf16, (1, Ep)  f32
                  w_qp_ref, b_qp_ref,     # (Ep, Dp)    bf16, (1, Dp)  f32
                  cbnt_ref,               # (Dp, Kp)    bf16   l2norm(cb)^T
                  cb_pq_ref, b_pq_ref,    # (Kp, DDp)   bf16  (fused cb@w_pq), (1, DDp) f32
                  w_dec_ref, b_dec_ref,   # (DDp, CPPp) bf16, (1, CPPp) f32
                  dec_ref,                # out (TM, CPPp)   bf16
                  loss_ref,               # out (1, 8, 128)  f32  per-block SSE
                  *, n_tokens, codebook_size, norm_latents):
    f32 = jnp.float32
    bf16 = jnp.bfloat16
    tm = patches_ref.shape[0]

    # ---- encoder stem: patch projection + gelu ----------------------------
    # TODO(synk): full vit_b_enc transformer blocks unavailable in the
    # reference source; stand-in is the patch-projection stem only.
    x = patches_ref[...]                                         # bf16
    h = jnp.dot(x, w_enc_ref[...], preferred_element_type=f32) + b_enc_ref[...]
    # TODO(synk): PyTorch nn.GELU default is exact-erf; tanh approximation
    # used here (stand-in encoder, ~1e-3 difference).
    h = jax.nn.gelu(h, approximate=True)

    # ---- quant_proj (1x1 conv over channels == matmul) ---------------------
    z = (jnp.dot(h.astype(bf16), w_qp_ref[...], preferred_element_type=f32)
         + b_qp_ref[...])

    # ---- cosine-sim vector quantization ------------------------------------
    zsq = jnp.sum(z * z, axis=-1, keepdims=True)                 # (TM, 1)
    inv_norm = jax.lax.rsqrt(zsq + 1e-12)
    z_n = z * inv_norm                                           # unit rows
    sim = jnp.dot(z_n.astype(bf16), cbnt_ref[...],
                  preferred_element_type=f32)                    # (TM, Kp)

    k_iota = jax.lax.broadcasted_iota(jnp.int32, sim.shape, 1)
    # mask padded codebook slots so they can never win the argmax
    sim = jnp.where(k_iota < codebook_size, sim, jnp.float32(-1e30))

    # first-index argmax via max + iota-min (Mosaic-safe, deterministic ties);
    # max_sim is reused by the closed-form loss below.
    max_sim = jnp.max(sim, axis=-1, keepdims=True)               # (TM, 1)
    masked_iota = jnp.where(sim >= max_sim, k_iota, sim.shape[-1])
    idx = jnp.min(masked_iota, axis=-1, keepdims=True)           # (TM, 1)
    onehot = (k_iota == idx).astype(bf16)                        # exact in bf16

    # ---- commitment loss (closed form, codes and z_n are unit-norm) --------
    if norm_latents:
        per_tok = 2.0 - 2.0 * max_sim                            # ||q - z_n||^2
    else:
        znorm = zsq * inv_norm                                   # ~ ||z||
        per_tok = zsq - 2.0 * znorm * max_sim + 1.0              # ||q - z||^2
    row = (jax.lax.broadcasted_iota(jnp.int32, per_tok.shape, 0)
           + pl.program_id(0) * tm)
    sse = jnp.sum(jnp.where(row < n_tokens, per_tok, 0.0))       # block scalar
    # dense (8,128) block per grid step -> no masked partial stores
    loss_ref[...] = jnp.full(loss_ref.shape, sse, f32)

    # ---- fused codebook-select + post_quant_proj, then decoder de-stem ------
    # TODO(synk): full vit_b_dec transformer blocks unavailable; de-stem only.
    d = (jnp.dot(onehot, cb_pq_ref[...], preferred_element_type=f32)
         + b_pq_ref[...])
    d = jax.nn.gelu(d, approximate=True)
    dec_ref[...] = (jnp.dot(d.astype(bf16), w_dec_ref[...],
                            preferred_element_type=f32)
                    + b_dec_ref[...]).astype(dec_ref.dtype)


class VQVAEPallas:
    """Deterministic-parameter VQVAE with the hot path in one Pallas kernel."""

    def __init__(self, *, image_size=16, n_channels=4, patch_size=4,
                 enc_dim=32, latent_dim=16, codebook_size=64, dec_dim=32,
                 commitment_weight=1.0, norm_latents=True, seed=0,
                 token_block=2048):
        self.image_size = image_size
        self.n_channels = n_channels
        self.patch_size = patch_size
        self.enc_dim = enc_dim
        self.latent_dim = latent_dim
        self.codebook_size = codebook_size
        self.dec_dim = dec_dim
        self.commitment_weight = commitment_weight
        self.norm_latents = norm_latents
        self.token_block = token_block

        cpp = n_channels * patch_size * patch_size
        self.cpp = cpp
        # lane-friendly padded dims (all feature axes -> multiples of 128)
        self.cpp_p = _round_up(cpp, _LANE)
        self.enc_p = _round_up(enc_dim, _LANE)
        self.lat_p = _round_up(latent_dim, _LANE)
        self.k_p = _round_up(codebook_size, _LANE)
        self.decd_p = _round_up(dec_dim, _LANE)

        key = jax.random.PRNGKey(seed)
        ks = jax.random.split(key, 6)

        def init(k, shape, fan_in):
            return (jax.random.normal(k, shape, jnp.float32)
                    * (1.0 / jnp.sqrt(jnp.float32(fan_in))))

        w_enc = init(ks[0], (cpp, enc_dim), cpp)
        b_enc = jnp.zeros((1, enc_dim), jnp.float32)
        w_qp = init(ks[1], (enc_dim, latent_dim), enc_dim)
        b_qp = jnp.zeros((1, latent_dim), jnp.float32)
        codebook = jax.random.normal(ks[2], (codebook_size, latent_dim),
                                     jnp.float32)
        w_pq = init(ks[3], (latent_dim, dec_dim), latent_dim)
        b_pq = jnp.zeros((1, dec_dim), jnp.float32)
        w_dec = init(ks[4], (dec_dim, cpp), dec_dim)
        b_dec = jnp.zeros((1, cpp), jnp.float32)

        def pad2(a, rows, cols, dtype):
            return jnp.pad(a, ((0, rows - a.shape[0]),
                               (0, cols - a.shape[1]))).astype(dtype)

        bf16 = jnp.bfloat16
        # matmul operands stored bf16; biases stay f32 (added post-accumulation)
        self.w_enc_p = pad2(w_enc, self.cpp_p, self.enc_p, bf16)
        self.b_enc_p = pad2(b_enc, 1, self.enc_p, jnp.float32)
        self.w_qp_p = pad2(w_qp, self.enc_p, self.lat_p, bf16)
        self.b_qp_p = pad2(b_qp, 1, self.lat_p, jnp.float32)
        # codebook l2-normalized ONCE here; transposed copy for the similarity
        # matmul, and fused with post_quant_proj for the decode path.
        cb_n = _l2norm(codebook)                                 # (K, D) f32
        self.cbnt_p = pad2(jnp.transpose(cb_n), self.lat_p, self.k_p, bf16)
        cb_pq = cb_n @ w_pq                                      # (K, dec) f32
        self.cb_pq_p = pad2(cb_pq, self.k_p, self.decd_p, bf16)
        self.b_pq_p = pad2(b_pq, 1, self.decd_p, jnp.float32)
        self.w_dec_p = pad2(w_dec, self.decd_p, self.cpp_p, bf16)
        self.b_dec_p = pad2(b_dec, 1, self.cpp_p, jnp.float32)

    # ---- layout helpers (NCHW <-> token-major patches) ----------------------
    def _patchify(self, x):
        B, C, H, W = x.shape
        P = self.patch_size
        hq, wq = H // P, W // P
        x = x.reshape(B, C, hq, P, wq, P)
        x = jnp.transpose(x, (0, 2, 4, 1, 3, 5))          # B, hq, wq, C, P, P
        return x.reshape(B * hq * wq, C * P * P).astype(jnp.bfloat16)

    def _unpatchify(self, p, B):
        P = self.patch_size
        C = self.n_channels
        hq = wq = self.image_size // P
        x = p.reshape(B, hq, wq, C, P, P)
        x = jnp.transpose(x, (0, 3, 1, 4, 2, 5))          # B, C, hq, P, wq, P
        return x.reshape(B, C, hq * P, wq * P)

    def __call__(self, x):
        B = x.shape[0]
        patches = self._patchify(x)                        # (N, cpp) bf16
        N = patches.shape[0]

        # token tile: large multiple of 8 (amortize per-step overhead),
        # capped by padded N
        tm = min(self.token_block, _round_up(N, _SUBLANE))
        tm = max(_SUBLANE, (tm // _SUBLANE) * _SUBLANE)
        n_pad = _round_up(N, tm)
        grid = n_pad // tm
        # v7x megacore: avoid collapsing a big workload into a single grid step
        # (second TensorCore would idle); split only when there is enough work.
        if grid == 1 and tm >= 1024:
            tm = _round_up((tm + 1) // 2, _SUBLANE)
            n_pad = _round_up(N, tm)
            grid = n_pad // tm

        patches_p = jnp.pad(
            patches, ((0, n_pad - N), (0, self.cpp_p - self.cpp)))  # bf16

        kernel = functools.partial(
            _vqvae_kernel,
            n_tokens=N,
            codebook_size=self.codebook_size,
            norm_latents=self.norm_latents)

        def resident(a):   # full array, same block every grid step -> stays in VMEM
            return pl.BlockSpec(a.shape, lambda i: (0, 0))

        in_specs = [
            pl.BlockSpec((tm, self.cpp_p), lambda i: (i, 0)),   # patch block
            resident(self.w_enc_p), resident(self.b_enc_p),
            resident(self.w_qp_p), resident(self.b_qp_p),
            resident(self.cbnt_p),
            resident(self.cb_pq_p), resident(self.b_pq_p),
            resident(self.w_dec_p), resident(self.b_dec_p),
        ]
        out_specs = (
            pl.BlockSpec((tm, self.cpp_p), lambda i: (i, 0)),           # dec (bf16)
            pl.BlockSpec((1, _SUBLANE, _LANE), lambda i: (i, 0, 0)),    # loss SSE
        )

        dec_p, loss_parts = pl.pallas_call(
            kernel,
            grid=(grid,),
            out_shape=(
                jax.ShapeDtypeStruct((n_pad, self.cpp_p), jnp.bfloat16),
                jax.ShapeDtypeStruct((grid, _SUBLANE, _LANE), jnp.float32),
            ),
            in_specs=in_specs,
            out_specs=out_specs,
            compiler_params=pltpu.CompilerParams(
                dimension_semantics=("parallel",),
                vmem_limit_bytes=32 * 1024 * 1024),
        )(patches_p, self.w_enc_p, self.b_enc_p, self.w_qp_p, self.b_qp_p,
          self.cbnt_p, self.cb_pq_p, self.b_pq_p, self.w_dec_p, self.b_dec_p)

        # commitment loss = weight * mean squared error over (N, latent_dim)
        code_loss = (self.commitment_weight * jnp.sum(loss_parts[:, 0, 0])
                     / jnp.float32(N * self.latent_dim))

        dec = self._unpatchify(
            dec_p[:N, :self.cpp].astype(jnp.float32), B)
        return dec, code_loss


if __name__ == "__main__":
    model = VQVAEPallas(image_size=16, n_channels=4, patch_size=4,
                        enc_dim=32, latent_dim=16, codebook_size=64,
                        dec_dim=32, commitment_weight=1.0, seed=0)

    key = jax.random.PRNGKey(0)
    x = jax.random.normal(key, (2, 4, 16, 16), jnp.float32)  # B C H W (NCHW)

    dec, code_loss = model(x)
    dec = jax.block_until_ready(dec)
    code_loss = jax.block_until_ready(code_loss)

    assert dec.shape == (2, 4, 16, 16)
    assert code_loss.shape == ()
    assert bool(jnp.isfinite(dec).all()) and bool(jnp.isfinite(code_loss))
    print("KERNEL_OK")
</pallas_src>

<mosaic_0001>
module attributes {stable_mosaic.version = 11 : i64} {
  func.func @_vqvae_kernel(%arg0: i32, %arg1: memref<32x128xbf16, #tpu.memory_space<vmem>>, %arg2: memref<128x128xbf16, #tpu.memory_space<vmem>>, %arg3: memref<1x128xf32, #tpu.memory_space<vmem>>, %arg4: memref<128x128xbf16, #tpu.memory_space<vmem>>, %arg5: memref<1x128xf32, #tpu.memory_space<vmem>>, %arg6: memref<128x128xbf16, #tpu.memory_space<vmem>>, %arg7: memref<128x128xbf16, #tpu.memory_space<vmem>>, %arg8: memref<1x128xf32, #tpu.memory_space<vmem>>, %arg9: memref<128x128xbf16, #tpu.memory_space<vmem>>, %arg10: memref<1x128xf32, #tpu.memory_space<vmem>>, %arg11: memref<32x128xbf16, #tpu.memory_space<vmem>>, %arg12: memref<1x8x128xf32, #tpu.memory_space<vmem>>) attributes {dimension_semantics = [#tpu.dimension_semantics<parallel>], iteration_bounds = array<i64: 1>, scalar_prefetch = 0 : i64, scratch_operands = 0 : i64, tpu.core_type = #tpu.core_type<tc>, window_params = [{transform_indices = @transform_0, window_bounds = array<i64: 32, 128>}, {pipeline_mode = #tpu.pipeline_mode<synchronous>, transform_indices = @transform_1, window_bounds = array<i64: 128, 128>}, {pipeline_mode = #tpu.pipeline_mode<synchronous>, transform_indices = @transform_2, window_bounds = array<i64: 1, 128>}, {pipeline_mode = #tpu.pipeline_mode<synchronous>, transform_indices = @transform_3, window_bounds = array<i64: 128, 128>}, {pipeline_mode = #tpu.pipeline_mode<synchronous>, transform_indices = @transform_4, window_bounds = array<i64: 1, 128>}, {pipeline_mode = #tpu.pipeline_mode<synchronous>, transform_indices = @transform_5, window_bounds = array<i64: 128, 128>}, {pipeline_mode = #tpu.pipeline_mode<synchronous>, transform_indices = @transform_6, window_bounds = array<i64: 128, 128>}, {pipeline_mode = #tpu.pipeline_mode<synchronous>, transform_indices = @transform_7, window_bounds = array<i64: 1, 128>}, {pipeline_mode = #tpu.pipeline_mode<synchronous>, transform_indices = @transform_8, window_bounds = array<i64: 128, 128>}, {pipeline_mode = #tpu.pipeline_mode<synchronous>, transform_indices = @transform_9, window_bounds = array<i64: 1, 128>}, {transform_indices = @transform_10, window_bounds = array<i64: 32, 128>}, {transform_indices = @transform_11, window_bounds = array<i64: 1, 8, 128>}]} {
    %c0 = arith.constant 0 : index
    %c0_0 = arith.constant 0 : index
    %0 = vector.load %arg1[%c0, %c0_0] : memref<32x128xbf16, #tpu.memory_space<vmem>>, vector<32x128xbf16>
    %c0_1 = arith.constant 0 : index
    %c0_2 = arith.constant 0 : index
    %1 = vector.load %arg2[%c0_1, %c0_2] : memref<128x128xbf16, #tpu.memory_space<vmem>>, vector<128x128xbf16>
    %cst = arith.constant dense<0.000000e+00> : vector<32x128xf32>
    %2 = tpu.matmul %0, %1, %cst {dimension_numbers = #tpu.dot_dimension_numbers<[1], [0], [0], [1], [0, 0, 1, 1], [], []>} : vector<32x128xbf16>, vector<128x128xbf16>, vector<32x128xf32> -> vector<32x128xf32>
    %c0_3 = arith.constant 0 : index
    %c0_4 = arith.constant 0 : index
    %3 = vector.load %arg3[%c0_3, %c0_4] : memref<1x128xf32, #tpu.memory_space<vmem>>, vector<1x128xf32>
    %4 = vector.broadcast %3 : vector<1x128xf32> to vector<32x128xf32>
    %5 = arith.addf %2, %4 : vector<32x128xf32>
    %6 = arith.mulf %5, %5 : vector<32x128xf32>
    %7 = arith.mulf %5, %6 : vector<32x128xf32>
    %cst_5 = arith.constant 4.471500e-02 : f32
    %8 = vector.broadcast %cst_5 : f32 to vector<32x128xf32>
    %9 = arith.mulf %8, %7 : vector<32x128xf32>
    %10 = arith.addf %5, %9 : vector<32x128xf32>
    %cst_6 = arith.constant 0.797884583 : f32
    %11 = vector.broadcast %cst_6 : f32 to vector<32x128xf32>
    %12 = arith.mulf %11, %10 : vector<32x128xf32>
    %13 = math.tanh %12 : vector<32x128xf32>
    %cst_7 = arith.constant 1.000000e+00 : f32
    %14 = vector.broadcast %cst_7 : f32 to vector<32x128xf32>
    %15 = arith.addf %14, %13 : vector<32x128xf32>
    %cst_8 = arith.constant 5.000000e-01 : f32
    %16 = vector.broadcast %cst_8 : f32 to vector<32x128xf32>
    %17 = arith.mulf %16, %15 : vector<32x128xf32>
    %18 = arith.mulf %5, %17 : vector<32x128xf32>
    %19 = arith.truncf %18 : vector<32x128xf32> to vector<32x128xbf16>
    %c0_9 = arith.constant 0 : index
    %c0_10 = arith.constant 0 : index
    %20 = vector.load %arg4[%c0_9, %c0_10] : memref<128x128xbf16, #tpu.memory_space<vmem>>, vector<128x128xbf16>
    %cst_11 = arith.constant dense<0.000000e+00> : vector<32x128xf32>
    %21 = tpu.matmul %19, %20, %cst_11 {dimension_numbers = #tpu.dot_dimension_numbers<[1], [0], [0], [1], [0, 0, 1, 1], [], []>} : vector<32x128xbf16>, vector<128x128xbf16>, vector<32x128xf32> -> vector<32x128xf32>
    %c0_12 = arith.constant 0 : index
    %c0_13 = arith.constant 0 : index
    %22 = vector.load %arg5[%c0_12, %c0_13] : memref<1x128xf32, #tpu.memory_space<vmem>>, vector<1x128xf32>
    %23 = vector.broadcast %22 : vector<1x128xf32> to vector<32x128xf32>
    %24 = arith.addf %21, %23 : vector<32x128xf32>
    %25 = arith.mulf %24, %24 : vector<32x128xf32>
    %cst_14 = arith.constant dense<0.000000e+00> : vector<32xf32>
    %26 = vector.multi_reduction <add>, %25, %cst_14 [1] : vector<32x128xf32> to vector<32xf32>
    %27 = vector.shape_cast %26 : vector<32xf32> to vector<32x1xf32>
    %cst_15 = arith.constant 9.99999996E-13 : f32
    %28 = vector.broadcast %cst_15 : f32 to vector<32x1xf32>
    %29 = arith.addf %27, %28 : vector<32x1xf32>
    %30 = math.rsqrt %29 : vector<32x1xf32>
    %31 = vector.broadcast %30 : vector<32x1xf32> to vector<32x128xf32>
    %32 = arith.mulf %24, %31 : vector<32x128xf32>
    %33 = arith.truncf %32 : vector<32x128xf32> to vector<32x128xbf16>
    %c0_16 = arith.constant 0 : index
    %c0_17 = arith.constant 0 : index
    %34 = vector.load %arg6[%c0_16, %c0_17] : memref<128x128xbf16, #tpu.memory_space<vmem>>, vector<128x128xbf16>
    %cst_18 = arith.constant dense<0.000000e+00> : vector<32x128xf32>
    %35 = tpu.matmul %33, %34, %cst_18 {dimension_numbers = #tpu.dot_dimension_numbers<[1], [0], [0], [1], [0, 0, 1, 1], [], []>} : vector<32x128xbf16>, vector<128x128xbf16>, vector<32x128xf32> -> vector<32x128xf32>
    %36 = tpu.iota {dimensions = array<i32: 1>} : vector<32x128xi32>
    %c64_i32 = arith.constant 64 : i32
    %37 = vector.broadcast %c64_i32 : i32 to vector<32x128xi32>
    %38 = arith.cmpi slt, %36, %37 : vector<32x128xi32>
    %cst_19 = arith.constant -1.000000e+30 : f32
    %39 = vector.broadcast %cst_19 : f32 to vector<32x128xf32>
    %40 = arith.select %38, %35, %39 : vector<32x128xi1>, vector<32x128xf32>
    %cst_20 = arith.constant dense<0xFF800000> : vector<32xf32>
    %41 = vector.multi_reduction <maximumf>, %40, %cst_20 [1] : vector<32x128xf32> to vector<32xf32>
    %42 = vector.shape_cast %41 : vector<32xf32> to vector<32x1xf32>
    %43 = vector.broadcast %42 : vector<32x1xf32> to vector<32x128xf32>
    %44 = arith.cmpf oge, %40, %43 : vector<32x128xf32>
    %c128_i32 = arith.constant 128 : i32
    %45 = vector.broadcast %c128_i32 : i32 to vector<32x128xi32>
    %46 = arith.select %44, %36, %45 : vector<32x128xi1>, vector<32x128xi32>
    %cst_21 = arith.constant dense<2147483647> : vector<32xi32>
    %47 = vector.multi_reduction <minsi>, %46, %cst_21 [1] : vector<32x128xi32> to vector<32xi32>
    %48 = vector.shape_cast %47 : vector<32xi32> to vector<32x1xi32>
    %49 = vector.broadcast %48 : vector<32x1xi32> to vector<32x128xi32>
    %50 = arith.cmpi eq, %36, %49 : vector<32x128xi32>
    %51 = arith.extui %50 : vector<32x128xi1> to vector<32x128xi32>
    %52 = arith.sitofp %51 : vector<32x128xi32> to vector<32x128xf32>
    %53 = arith.truncf %52 : vector<32x128xf32> to vector<32x128xbf16>
    %cst_22 = arith.constant 2.000000e+00 : f32
    %54 = vector.broadcast %cst_22 : f32 to vector<32x1xf32>
    %55 = arith.mulf %54, %42 : vector<32x1xf32>
    %cst_23 = arith.constant 2.000000e+00 : f32
    %56 = vector.broadcast %cst_23 : f32 to vector<32x1xf32>
    %57 = arith.subf %56, %55 : vector<32x1xf32>
    %58 = tpu.iota {dimensions = array<i32: 0>} : vector<32x1xi32>
    %c32_i32 = arith.constant 32 : i32
    %59 = arith.muli %arg0, %c32_i32 : i32
    %60 = vector.broadcast %59 : i32 to vector<32x1xi32>
    %61 = arith.addi %58, %60 : vector<32x1xi32>
    %c32_i32_24 = arith.constant 32 : i32
    %62 = vector.broadcast %c32_i32_24 : i32 to vector<32x1xi32>
    %63 = arith.cmpi slt, %61, %62 : vector<32x1xi32>
    %cst_25 = arith.constant 0.000000e+00 : f32
    %64 = vector.broadcast %cst_25 : f32 to vector<32x1xf32>
    %65 = arith.select %63, %57, %64 : vector<32x1xi1>, vector<32x1xf32>
    %66 = vector.shape_cast %65 : vector<32x1xf32> to vector<1x32x1xf32>
    %cst_26 = arith.constant dense<0.000000e+00> : vector<1xf32>
    %67 = vector.multi_reduction <add>, %66, %cst_26 [1, 2] : vector<1x32x1xf32> to vector<1xf32>
    %68 = vector.shape_cast %67 : vector<1xf32> to vector<1x1x1xf32>
    %69 = vector.extract %68[0, 0, 0] : f32 from vector<1x1x1xf32>
    %70 = vector.broadcast %69 : f32 to vector<1x8x128xf32>
    %c0_27 = arith.constant 0 : index
    %c0_28 = arith.constant 0 : index
    %c0_29 = arith.constant 0 : index
    %71 = vector.load %arg12[%c0_27, %c0_28, %c0_29] : memref<1x8x128xf32, #tpu.memory_space<vmem>>, vector<1x8x128xf32>
    tpu.vector_store %arg12[%c0_27, %c0_28, %c0_29], %70 {strides = array<i32>} : memref<1x8x128xf32, #tpu.memory_space<vmem>>, vector<1x8x128xf32>,
    %c0_30 = arith.constant 0 : index
    %c0_31 = arith.constant 0 : index
    %72 = vector.load %arg7[%c0_30, %c0_31] : memref<128x128xbf16, #tpu.memory_space<vmem>>, vector<128x128xbf16>
    %cst_32 = arith.constant dense<0.000000e+00> : vector<32x128xf32>
    %73 = tpu.matmul %53, %72, %cst_32 {dimension_numbers = #tpu.dot_dimension_numbers<[1], [0], [0], [1], [0, 0, 1, 1], [], []>} : vector<32x128xbf16>, vector<128x128xbf16>, vector<32x128xf32> -> vector<32x128xf32>
    %c0_33 = arith.constant 0 : index
    %c0_34 = arith.constant 0 : index
    %74 = vector.load %arg8[%c0_33, %c0_34] : memref<1x128xf32, #tpu.memory_space<vmem>>, vector<1x128xf32>
    %75 = vector.broadcast %74 : vector<1x128xf32> to vector<32x128xf32>
    %76 = arith.addf %73, %75 : vector<32x128xf32>
    %77 = arith.mulf %76, %76 : vector<32x128xf32>
    %78 = arith.mulf %76, %77 : vector<32x128xf32>
    %cst_35 = arith.constant 4.471500e-02 : f32
    %79 = vector.broadcast %cst_35 : f32 to vector<32x128xf32>
    %80 = arith.mulf %79, %78 : vector<32x128xf32>
    %81 = arith.addf %76, %80 : vector<32x128xf32>
    %cst_36 = arith.constant 0.797884583 : f32
    %82 = vector.broadcast %cst_36 : f32 to vector<32x128xf32>
    %83 = arith.mulf %82, %81 : vector<32x128xf32>
    %84 = math.tanh %83 : vector<32x128xf32>
    %cst_37 = arith.constant 1.000000e+00 : f32
    %85 = vector.broadcast %cst_37 : f32 to vector<32x128xf32>
    %86 = arith.addf %85, %84 : vector<32x128xf32>
    %cst_38 = arith.constant 5.000000e-01 : f32
    %87 = vector.broadcast %cst_38 : f32 to vector<32x128xf32>
    %88 = arith.mulf %87, %86 : vector<32x128xf32>
    %89 = arith.mulf %76, %88 : vector<32x128xf32>
    %90 = arith.truncf %89 : vector<32x128xf32> to vector<32x128xbf16>
    %c0_39 = arith.constant 0 : index
    %c0_40 = arith.constant 0 : index
    %91 = vector.load %arg9[%c0_39, %c0_40] : memref<128x128xbf16, #tpu.memory_space<vmem>>, vector<128x128xbf16>
    %cst_41 = arith.constant dense<0.000000e+00> : vector<32x128xf32>
    %92 = tpu.matmul %90, %91, %cst_41 {dimension_numbers = #tpu.dot_dimension_numbers<[1], [0], [0], [1], [0, 0, 1, 1], [], []>} : vector<32x128xbf16>, vector<128x128xbf16>, vector<32x128xf32> -> vector<32x128xf32>
    %c0_42 = arith.constant 0 : index
    %c0_43 = arith.constant 0 : index
    %93 = vector.load %arg10[%c0_42, %c0_43] : memref<1x128xf32, #tpu.memory_space<vmem>>, vector<1x128xf32>
    %94 = vector.broadcast %93 : vector<1x128xf32> to vector<32x128xf32>
    %95 = arith.addf %92, %94 : vector<32x128xf32>
    %96 = arith.truncf %95 : vector<32x128xf32> to vector<32x128xbf16>
    %c0_44 = arith.constant 0 : index
    %c0_45 = arith.constant 0 : index
    %97 = vector.load %arg11[%c0_44, %c0_45] : memref<32x128xbf16, #tpu.memory_space<vmem>>, vector<32x128xbf16>
    tpu.vector_store %arg11[%c0_44, %c0_45], %96 {strides = array<i32>} : memref<32x128xbf16, #tpu.memory_space<vmem>>, vector<32x128xbf16>,
    return
  }
  func.func @transform_0(%arg0: i32) -> (i32, i32) {
    %c0_i32 = arith.constant 0 : i32
    %c0_i32_0 = arith.constant 0 : i32
    return %arg0, %c0_i32 : i32, i32
  }
  func.func @transform_1(%arg0: i32) -> (i32, i32) {
    %c0_i32 = arith.constant 0 : i32
    %c0_i32_0 = arith.constant 0 : i32
    %c0_i32_1 = arith.constant 0 : i32
    return %c0_i32, %c0_i32_0 : i32, i32
  }
  func.func @transform_2(%arg0: i32) -> (i32, i32) {
    %c0_i32 = arith.constant 0 : i32
    %c0_i32_0 = arith.constant 0 : i32
    %c0_i32_1 = arith.constant 0 : i32
    return %c0_i32, %c0_i32_0 : i32, i32
  }
  func.func @transform_3(%arg0: i32) -> (i32, i32) {
    %c0_i32 = arith.constant 0 : i32
    %c0_i32_0 = arith.constant 0 : i32
    %c0_i32_1 = arith.constant 0 : i32
    return %c0_i32, %c0_i32_0 : i32, i32
  }
  func.func @transform_4(%arg0: i32) -> (i32, i32) {
    %c0_i32 = arith.constant 0 : i32
    %c0_i32_0 = arith.constant 0 : i32
    %c0_i32_1 = arith.constant 0 : i32
    return %c0_i32, %c0_i32_0 : i32, i32
  }
  func.func @transform_5(%arg0: i32) -> (i32, i32) {
    %c0_i32 = arith.constant 0 : i32
    %c0_i32_0 = arith.constant 0 : i32
    %c0_i32_1 = arith.constant 0 : i32
    return %c0_i32, %c0_i32_0 : i32, i32
  }
  func.func @transform_6(%arg0: i32) -> (i32, i32) {
    %c0_i32 = arith.constant 0 : i32
    %c0_i32_0 = arith.constant 0 : i32
    %c0_i32_1 = arith.constant 0 : i32
    return %c0_i32, %c0_i32_0 : i32, i32
  }
  func.func @transform_7(%arg0: i32) -> (i32, i32) {
    %c0_i32 = arith.constant 0 : i32
    %c0_i32_0 = arith.constant 0 : i32
    %c0_i32_1 = arith.constant 0 : i32
    return %c0_i32, %c0_i32_0 : i32, i32
  }
  func.func @transform_8(%arg0: i32) -> (i32, i32) {
    %c0_i32 = arith.constant 0 : i32
    %c0_i32_0 = arith.constant 0 : i32
    %c0_i32_1 = arith.constant 0 : i32
    return %c0_i32, %c0_i32_0 : i32, i32
  }
  func.func @transform_9(%arg0: i32) -> (i32, i32) {
    %c0_i32 = arith.constant 0 : i32
    %c0_i32_0 = arith.constant 0 : i32
    %c0_i32_1 = arith.constant 0 : i32
    return %c0_i32, %c0_i32_0 : i32, i32
  }
  func.func @transform_10(%arg0: i32) -> (i32, i32) {
    %c0_i32 = arith.constant 0 : i32
    %c0_i32_0 = arith.constant 0 : i32
    return %arg0, %c0_i32 : i32, i32
  }
  func.func @transform_11(%arg0: i32) -> (i32, i32, i32) {
    %c0_i32 = arith.constant 0 : i32
    %c0_i32_0 = arith.constant 0 : i32
    %c0_i32_1 = arith.constant 0 : i32
    return %arg0, %c0_i32, %c0_i32_0 : i32, i32, i32
  }
}

</mosaic_0001>

<bundles_post_ra>
// kernel: tpu_custom_call.1
= control target key start
LH: loop header
LB: loop body
LE: loop exit
PB: predicated region body
PF: predicated region fallthrough
CT: control target
= control target key end

     0   :  { %17 = vsyncpa [#allocation3], 0  ;;  %s1752_s0 = inlined_call_operand.hbm [shape: bf16[32,128], index: 0, kind: input, shape index: {}]   ;;  %s1753_s1 = inlined_call_operand.hbm [shape: bf16[128,128], index: 1, kind: input, shape index: {}]   ;;  %s1754_s2 = inlined_call_operand.vmem [shape: f32[1,128], index: 2, kind: input, shape index: {}]   ;;  %s1755_s3 = inlined_call_operand.hbm [shape: bf16[128,128], index: 3, kind: input, shape index: {}]   ;;  %s1756_s4 = inlined_call_operand.vmem [shape: f32[1,128], index: 4, kind: input, shape index: {}]   ;;  %s1757_s5 = inlined_call_operand.hbm [shape: bf16[128,128], index: 5, kind: input, shape index: {}]   ;;  %s1758_s6 = inlined_call_operand.hbm [shape: bf16[128,128], index: 6, kind: input, shape index: {}]   ;;  %s1759_s7 = inlined_call_operand.vmem [shape: f32[1,128], index: 7, kind: input, shape index: {}]   ;;  %s1760_s8 = inlined_call_operand.hbm [shape: bf16[128,128], index: 8, kind: input, shape index: {}]   ;;  %s1761_s9 = inlined_call_operand.vmem [shape: f32[1,128], index: 9, kind: input, shape index: {}]   ;;  %s1762_s10 = inlined_call_operand.hbm [shape: bf16[32,128], index: 10, kind: output, shape index: {0}]   ;;  %s1763_s11 = inlined_call_operand.hbm [shape: f32[1,8,128], index: 11, kind: output, shape index: {1}]  }
   0x1   :  { %18 = vsyncpa [#allocation6], 0 }
   0x2   :  { %19 = vsyncpa [#allocation9], 0 }
   0x3   :  { %20 = vsyncpa [#allocation12], 0 }
   0x4   :  { %21 = vsyncpa [#allocation4], 0 }
   0x5   :  { %22 = vsyncpa [#allocation15], 0  ;;  %s1516_s17 = smov [#allocation5]   ;;  %s1517_s19 = smov [#allocation8]  }
   0x6   :  { %s40_s18 = sshll.u32 %s1516_s17, 4  ;;  %s68_s20 = sshll.u32 %s1517_s19, 4  ;;  %s41_s18 = int_to_ptr.vmem [resolvable:$true] %s40_s18  ;;  %s1587_s20 = int_to_ptr.vmem [resolvable:$true] %s68_s20 }
   0x7   :  { %s1328_s23 = scalar_lea.hbm %s1753_s1, 1024 }
   0x8   :  { %p1329_p0 = scmp.ne.s32.totalorder %s1753_s1, %s1328_s23  ;;  %p1332_p1 = scmp.lt.u32.totalorder %s1328_s23, %s1753_s1 }
   0xa   :  { %p1334_p2 = pnand %p1332_p1, %p1329_p0 }
   0xc   :  { %1337 = shalt.err (!%p1334_p2)
}
   0xd   :  { %s1338_s28 = scalar_lea.vmem %s41_s18, 1024  ;;  %p1343_p4 = scmp.lt.s32.totalorder %s41_s18, %s41_s18 }
   0xe   :  { %p1339_p3 = scmp.ne.s32.totalorder %s41_s18, %s1338_s28  ;;  %p1344_p5 = scmp.lt.s32.totalorder %s1338_s28, %s1338_s28 }
  0x10   :  { %p1345_p6 = por %p1344_p5, %p1343_p4 }
  0x12   :  { %p1346_p7 = pnand %p1345_p6, %p1339_p3 }
  0x14   :  { %1349 = shalt.err (!%p1346_p7)
}
  0x15   :  { %s1518_s29 = smov 64   ;;  %s1519_s30 = smov 4  }
  0x16   :  { %46 = dma.hbm_to_vmem [thread:$0]  %s1753_s1, 1024, %s41_s18, [#allocation6], %s1518_s29, %s1518_s29, %s1519_s30  }
  0x17   :  { %s1350_s16 = scalar_lea.hbm %s1757_s5, 1024 }
  0x18   :  { %p1351_p8 = scmp.ne.s32.totalorder %s1757_s5, %s1350_s16  ;;  %p1354_p9 = scmp.lt.u32.totalorder %s1350_s16, %s1757_s5 }
  0x1a   :  { %p1356_p10 = pnand %p1354_p9, %p1351_p8 }
  0x1c   :  { %1359 = shalt.err (!%p1356_p10)
}
  0x1d   :  { %s1360_s23 = scalar_lea.vmem %s1587_s20, 1024  ;;  %p1365_p12 = scmp.lt.s32.totalorder %s1587_s20, %s1587_s20 }
  0x1e   :  { %p1361_p11 = scmp.ne.s32.totalorder %s1587_s20, %s1360_s23  ;;  %p1366_p13 = scmp.lt.s32.totalorder %s1360_s23, %s1360_s23 }
  0x20   :  { %p1367_p0 = por %p1366_p13, %p1365_p12 }
  0x22   :  { %p1368_p1 = pnand %p1367_p0, %p1361_p11 }
  0x24   :  { %1371 = shalt.err (!%p1368_p1)
}
  0x25   :  { %74 = dma.hbm_to_vmem [thread:$0]  %s1757_s5, 1024, %s1587_s20, [#allocation9], %s1518_s29, %s1518_s29, %s1519_s30  }
  0x26   :  { %s1520_s24 = smov [#allocation2]   ;;  %s1521_s26 = smov [#allocation7]  }
  0x27   :  { %s28_s25 = sshll.u32 %s1520_s24, 4  ;;  %s54_s27 = sshll.u32 %s1521_s26, 4  ;;  %s29_s25 = int_to_ptr.vmem [resolvable:$true] %s28_s25  ;;  %s1624_s27 = int_to_ptr.vmem [resolvable:$true] %s54_s27 }
  0x28   :  { %s1372_s13 = scalar_lea.hbm %s1752_s0, 256 }
  0x29   :  { %p1373_p2 = scmp.ne.s32.totalorder %s1752_s0, %s1372_s13  ;;  %p1376_p3 = scmp.lt.u32.totalorder %s1372_s13, %s1752_s0 }
  0x2b   :  { %p1378_p4 = pnand %p1376_p3, %p1373_p2 }
  0x2d   :  { %1381 = shalt.err (!%p1378_p4)
}
  0x2e   :  { %s1382_s5 = scalar_lea.vmem %s29_s25, 256  ;;  %p1387_p6 = scmp.lt.s32.totalorder %s29_s25, %s29_s25 }
  0x2f   :  { %p1383_p5 = scmp.ne.s32.totalorder %s29_s25, %s1382_s5  ;;  %p1388_p7 = scmp.lt.s32.totalorder %s1382_s5, %s1382_s5 }
  0x31   :  { %p1389_p8 = por %p1388_p7, %p1387_p6 }
  0x33   :  { %p1390_p9 = pnand %p1389_p8, %p1383_p5 }
  0x35   :  { %1393 = shalt.err (!%p1390_p9)
}
  0x36   :  { %34 = dma.hbm_to_vmem [thread:$0]  %s1752_s0, 256, %s29_s25, [#allocation3], %s1518_s29, %s1518_s29, %s1519_s30  }
  0x37   :  { %s1394_s23 = scalar_lea.hbm %s1755_s3, 1024 }
  0x38   :  { %p1395_p10 = scmp.ne.s32.totalorder %s1755_s3, %s1394_s23  ;;  %p1398_p11 = scmp.lt.u32.totalorder %s1394_s23, %s1755_s3 }
  0x3a   :  { %p1400_p12 = pnand %p1398_p11, %p1395_p10 }
  0x3c   :  { %1403 = shalt.err (!%p1400_p12)
}
  0x3d   :  { %s1404_s28 = scalar_lea.vmem %s1624_s27, 1024  ;;  %p1409_p0 = scmp.lt.s32.totalorder %s1624_s27, %s1624_s27 }
  0x3e   :  { %p1405_p13 = scmp.ne.s32.totalorder %s1624_s27, %s1404_s28  ;;  %p1410_p1 = scmp.lt.s32.totalorder %s1404_s28, %s1404_s28 }
  0x40   :  { %p1411_p2 = por %p1410_p1, %p1409_p0 }
  0x42   :  { %p1412_p3 = pnand %p1411_p2, %p1405_p13 }
  0x44   :  { %1415 = shalt.err (!%p1412_p3)
}
  0x45   :  { %60 = dma.hbm_to_vmem [thread:$0]  %s1755_s3, 1024, %s1624_s27, [#allocation6], %s1518_s29, %s1518_s29, %s1519_s30  }
  0x46   :  { %s1522_s12 = smov [#allocation10]   ;;  %s1523_s14 = smov [#allocation11]  }
  0x47   :  { %s80_s13 = sshll.u32 %s1522_s12, 4  ;;  %s94_s15 = sshll.u32 %s1523_s14, 4  ;;  %s81_s13 = int_to_ptr.vmem [resolvable:$true] %s80_s13  ;;  %s1661_s15 = int_to_ptr.vmem [resolvable:$true] %s94_s15 }
  0x48   :  { %s1416_s5 = scalar_lea.hbm %s1758_s6, 1024 }
  0x49   :  { %p1417_p4 = scmp.ne.s32.totalorder %s1758_s6, %s1416_s5  ;;  %p1420_p5 = scmp.lt.u32.totalorder %s1416_s5, %s1758_s6 }
  0x4b   :  { %p1422_p6 = pnand %p1420_p5, %p1417_p4 }
  0x4d   :  { %1425 = shalt.err (!%p1422_p6)
}
  0x4e   :  { %s1426_s3 = scalar_lea.vmem %s81_s13, 1024  ;;  %p1431_p8 = scmp.lt.s32.totalorder %s81_s13, %s81_s13 }
  0x4f   :  { %p1427_p7 = scmp.ne.s32.totalorder %s81_s13, %s1426_s3  ;;  %p1432_p9 = scmp.lt.s32.totalorder %s1426_s3, %s1426_s3 }
  0x51   :  { %p1433_p10 = por %p1432_p9, %p1431_p8 }
  0x53   :  { %p1434_p11 = pnand %p1433_p10, %p1427_p7 }
  0x55   :  { %1437 = shalt.err (!%p1434_p11)
}
  0x56   :  { %86 = dma.hbm_to_vmem [thread:$0]  %s1758_s6, 1024, %s81_s13, [#allocation9], %s1518_s29, %s1518_s29, %s1519_s30  }
  0x57   :  { %s1438_s24 = scalar_lea.hbm %s1760_s8, 1024 }
  0x58   :  { %p1439_p12 = scmp.ne.s32.totalorder %s1760_s8, %s1438_s24  ;;  %p1442_p13 = scmp.lt.u32.totalorder %s1438_s24, %s1760_s8 }
  0x5a   :  { %p1444_p0 = pnand %p1442_p13, %p1439_p12 }
  0x5c   :  { %1447 = shalt.err (!%p1444_p0)
}
  0x5d   :  { %s1448_s12 = scalar_lea.vmem %s1661_s15, 1024  ;;  %p1453_p2 = scmp.lt.s32.totalorder %s1661_s15, %s1661_s15 }
  0x5e   :  { %p1449_p1 = scmp.ne.s32.totalorder %s1661_s15, %s1448_s12  ;;  %p1454_p3 = scmp.lt.s32.totalorder %s1448_s12, %s1448_s12 }
  0x60   :  { %p1455_p4 = por %p1454_p3, %p1453_p2 }
  0x62   :  { %p1456_p5 = pnand %p1455_p4, %p1449_p1 }
  0x64   :  { %1459 = shalt.err (!%p1456_p5)
}
  0x65   :  { %100 = dma.hbm_to_vmem [thread:$0]  %s1760_s8, 1024, %s1661_s15, [#allocation12], %s1518_s29, %s1518_s29, %s1519_s30  }
  0x66   :  { %1504 = dma.done.wait [#allocation3], 256  }
  0x67   :  { %1505 = vsyncadd [#allocation3], 4294967040 }
  0x68   :  { %1506 = dma.done.wait [#allocation6], 2048  }
  0x69   :  { %1507 = vsyncadd [#allocation6], 4294965248 }
  0x6a   :  { %1508 = dma.done.wait [#allocation9], 2048  }
  0x6b   :  { %1509 = vsyncadd [#allocation9], 4294965248 }
  0x6c   :  { %1510 = dma.done.wait [#allocation12], 1024  }
  0x6d   :  { %1511 = vsyncadd [#allocation12], 4294966272  ;;  %v1262_v0 = vld [vmem:[#allocation5] sm:$0xff]   ;;  %v1263_v1 = vld [vmem:[#allocation5 + $0x8] sm:$0xff]   ;;  %vm675_vm3 = vcmask 7168  }
  0x6e   :  { %1149 = vmatprep.subr.bf16.mxu0 %v1262_v0  ;;  %v1264_v2 = vld [vmem:[#allocation5 + $0x10] sm:$0xff]   ;;  %v1265_v3 = vld [vmem:[#allocation5 + $0x18] sm:$0xff]   ;;  %v1266_v5 = vld [vmem:[#allocation5 + $0x20] sm:$0xff]  }
  0x6f   :  { %1150 = vmatpush3.bf16.msra.mxu0 %v1262_v0  ;;  %v1270_v4 = vld [vmem:[#allocation2] sm:$0xff]   ;;  %v1267_v6 = vld [vmem:[#allocation5 + $0x28] sm:$0xff]   ;;  %v1269_v8 = vld [vmem:[#allocation5 + $0x38] sm:$0xff]  }
  0x70   :  { %1151 = vmatprep.subr.bf16.mxu0 %v1263_v1  ;;  %1165 = vmatprep.mubr.bf16.mxu0 %v1270_v4  ;;  %v1268_v7 = vld [vmem:[#allocation5 + $0x30] sm:$0xff]   ;;  %v1271_v9 = vld [vmem:[#allocation2 + $0x8] sm:$0xff]   ;;  %v1272_v10 = vld [vmem:[#allocation7] sm:$0xff]  }
  0x71   :  { %1169 = vmatprep.subr.bf16.mxu1 %v1272_v10  ;;  %v1273_v11 = vld [vmem:[#allocation7 + $0x8] sm:$0xff]   ;;  %v1274_v12 = vld [vmem:[#allocation7 + $0x10] sm:$0xff]   ;;  %v1275_v13 = vld [vmem:[#allocation7 + $0x18] sm:$0xff]  }
  0x72   :  { %1170 = vmatpush3.bf16.msra.mxu1 %v1272_v10  ;;  %v1276_v14 = vld [vmem:[#allocation7 + $0x20] sm:$0xff]   ;;  %v1277_v15 = vld [vmem:[#allocation7 + $0x28] sm:$0xff]   ;;  %v1278_v16 = vld [vmem:[#allocation7 + $0x30] sm:$0xff]  }
  0x73   :  { %1152 = vmatpush3.bf16.msra.mxu0 %v1263_v1  ;;  %1171 = vmatprep.subr.bf16.mxu1 %v1273_v11  ;;  %v1279_v17 = vld [vmem:[#allocation7 + $0x38] sm:$0xff]   ;;  %v1026_v18 = vld [vmem:[%s1754_s2] ss:$0 sm:$0xff]  ;;  %v1280_v1 = vld [vmem:[#allocation8] sm:$0xff]  }
  0x74   :  { %1153 = vmatprep.subr.bf16.mxu0 %v1264_v2  ;;  %v1037_v4 = vld [vmem:[%s1756_s4] ss:$0 sm:$0xff] }
  0x76   :  { %1172 = vmatpush3.bf16.msra.mxu1 %v1273_v11 }
  0x77   :  { %1154 = vmatpush3.bf16.msra.mxu0 %v1264_v2  ;;  %1173 = vmatprep.subr.bf16.mxu1 %v1274_v12  ;;  %v1281_v2 = vld [vmem:[#allocation8 + $0x8] sm:$0xff]  }
  0x78   :  { %1155 = vmatprep.subr.bf16.mxu0 %v1265_v3 }
  0x7a   :  { %1174 = vmatpush3.bf16.msra.mxu1 %v1274_v12 }
  0x7b   :  { %1156 = vmatpush3.bf16.msra.mxu0 %v1265_v3  ;;  %1175 = vmatprep.subr.bf16.mxu1 %v1275_v13  ;;  %v1282_v3 = vld [vmem:[#allocation8 + $0x10] sm:$0xff]  }
  0x7c   :  { %1157 = vmatprep.subr.bf16.mxu0 %v1266_v5 }
  0x7e   :  { %1176 = vmatpush3.bf16.msra.mxu1 %v1275_v13 }
  0x7f   :  { %1158 = vmatpush3.bf16.msra.mxu0 %v1266_v5  ;;  %1177 = vmatprep.subr.bf16.mxu1 %v1276_v14 }
  0x80   :  { %1159 = vmatprep.subr.bf16.mxu0 %v1267_v6 }
  0x82   :  { %1178 = vmatpush3.bf16.msra.mxu1 %v1276_v14 }
  0x83   :  { %1160 = vmatpush3.bf16.msra.mxu0 %v1267_v6  ;;  %1179 = vmatprep.subr.bf16.mxu1 %v1277_v15 }
  0x84   :  { %1161 = vmatprep.subr.bf16.mxu0 %v1268_v7 }
  0x86   :  { %1180 = vmatpush3.bf16.msra.mxu1 %v1277_v15 }
  0x87   :  { %1162 = vmatpush3.bf16.msra.mxu0 %v1268_v7  ;;  %1181 = vmatprep.subr.bf16.mxu1 %v1278_v16 }
  0x88   :  { %1163 = vmatprep.subr.bf16.mxu0 %v1269_v8 }
  0x8a   :  { %1182 = vmatpush3.bf16.msra.mxu1 %v1278_v16 }
  0x8b   :  { %1164 = vmatpush3.bf16.msra.mxu0 %v1269_v8  ;;  %1183 = vmatprep.subr.bf16.mxu1 %v1279_v17 }
  0x8c   :  { %1189 = vmatprep.subr.bf16.mxu0 %v1280_v1 }
  0x8e   :  { %1166 = vmatmul.mubr.bf16.vlgmr.msra.gmra.mrb[0].mxu0 %v1271_v9  ;;  %1184 = vmatpush3.bf16.msra.mxu1 %v1279_v17  ;;  %v1283_v17 = vld [vmem:[#allocation8 + $0x18] sm:$0xff]  }
  0x8f   :  { %1190 = vmatpush3.bf16.msra.mxu0 %v1280_v1 }
  0x90   :  { %1191 = vmatprep.subr.bf16.mxu0 %v1281_v2 }
  0x93   :  { %1192 = vmatpush3.bf16.msra.mxu0 %v1281_v2 }
  0x94   :  { %1193 = vmatprep.subr.bf16.mxu0 %v1282_v3 }
  0x97   :  { %1194 = vmatpush3.bf16.msra.mxu0 %v1282_v3 }
  0x98   :  { %1195 = vmatprep.subr.bf16.mxu0 %v1283_v17 }
  0x9b   :  { %1196 = vmatpush3.bf16.msra.mxu0 %v1283_v17 }
 0x161   :  { %v1167_v19 = vpop.f32.mrb[0].mxu0 }
 0x162   :  { %v252_v20 = vadd.f32 %v1167_v19, %v1026_v18  ;;  %v243_v21 = vpop.f32.mrb[1].mxu0  ;;  %v1285_v19 = vld [vmem:[#allocation8 + $0x28] sm:$0xff]  }
 0x163   :  { %v244_v22 = vadd.f32 %v1026_v18, %v243_v21  ;;  %v1168_v23 = vpop.f32.mrb[2].mxu0  ;;  %v1287_v21 = vld [vmem:[#allocation8 + $0x38] sm:$0xff]  }
 0x164   :  { %v260_v24 = vmul.f32 %v252_v20, %v252_v20  ;;  %v255_v25 = vadd.f32 %v1168_v23, %v1026_v18  ;;  %v246_v26 = vpop.f32.mrb[3].mxu0 }
 0x165   :  { %v258_v27 = vmul.f32 %v244_v22, %v244_v22  ;;  %v247_v28 = vadd.f32 %v1026_v18, %v246_v26  ;;  %v1284_v18 = vld [vmem:[#allocation8 + $0x20] sm:$0xff]  }
 0x166   :  { %v264_v29 = vmul.f32 %v260_v24, %v252_v20  ;;  %v261_v30 = vmul.f32 %v255_v25, %v255_v25  ;;  %1197 = vmatprep.subr.bf16.mxu0 %v1284_v18 }
 0x167   :  { %v262_v31 = vmul.f32 %v258_v27, %v244_v22  ;;  %v259_v32 = vmul.f32 %v247_v28, %v247_v28  ;;  %1198 = vmatpush3.bf16.msra.mxu0 %v1284_v18 }
 0x168   :  { %v268_v33 = vmul.f32 0.044715, %v264_v29  ;;  %v265_v34 = vmul.f32 %v261_v30, %v255_v25  ;;  %1199 = vmatprep.subr.bf16.mxu0 %v1285_v19 }
 0x169   :  { %v266_v35 = vmul.f32 0.044715, %v262_v31  ;;  %v263_v36 = vmul.f32 %v259_v32, %v247_v28 }
 0x16a   :  { %v272_v37 = vadd.f32 %v268_v33, %v252_v20  ;;  %v269_v38 = vmul.f32 0.044715, %v265_v34 }
 0x16b   :  { %v267_v39 = vmul.f32 0.044715, %v263_v36  ;;  %v270_v40 = vadd.f32 %v266_v35, %v244_v22  ;;  %1200 = vmatpush3.bf16.msra.mxu0 %v1285_v19 }
 0x16c   :  { %v276_v41 = vmul.f32 0.7978846, %v272_v37  ;;  %v273_v42 = vadd.f32 %v269_v38, %v255_v25 }
 0x16d   :  { %v271_v43 = vadd.f32 %v267_v39, %v247_v28  ;;  %v274_v44 = vmul.f32 0.7978846, %v270_v40  ;;  %v555_v40 = vlaneseq }
 0x16e   :  { %1304 = vtanh.f32 %v276_v41  ;;  %v277_v45 = vmul.f32 0.7978846, %v273_v42 }
 0x16f   :  { %v275_v46 = vmul.f32 0.7978846, %v271_v43  ;;  %1306 = vtanh.f32 %v274_v44  ;;  %v1704_v41 = vand.u32 127, %v555_v40  ;;  %v1295_v40 = vld [vmem:[#allocation10 + $0x38] sm:$0xff]  }
 0x170   :  { %1308 = vtanh.f32 %v277_v45 }
 0x171   :  { %1310 = vtanh.f32 %v275_v46  ;;  %vm557_vm0 = vcmp.lt.s32.totalorder %v1704_v41, 64 }
 0x178   :  { %v1305_v47 = vpop.eup %1304 }
 0x179   :  { %v1307_v48 = vpop.eup %1306  ;;  %v284_v49 = vadd.f32 1.0, %v1305_v47 }
 0x17a   :  { %v1309_v50 = vpop.eup %1308  ;;  %v282_v51 = vadd.f32 1.0, %v1307_v48 }
 0x17b   :  { %v1311_v52 = vpop.eup %1310  ;;  %v285_v53 = vadd.f32 1.0, %v1309_v50  ;;  %v288_v54 = vmul.f32 0.5, %v284_v49 }
 0x17c   :  { %v283_v55 = vadd.f32 1.0, %v1311_v52  ;;  %v286_v56 = vmul.f32 0.5, %v282_v51 }
 0x17d   :  { %v289_v57 = vmul.f32 0.5, %v285_v53  ;;  %v292_v59 = vmul.f32 %v288_v54, %v252_v20  ;;  %v1286_v20 = vld [vmem:[#allocation8 + $0x30] sm:$0xff]  }
 0x17e   :  { %v287_v58 = vmul.f32 0.5, %v283_v55  ;;  %v290_v61 = vmul.f32 %v286_v56, %v244_v22  ;;  %1201 = vmatprep.subr.bf16.mxu0 %v1286_v20 }
 0x17f   :  { %v293_v60 = vmul.f32 %v289_v57, %v255_v25  ;;  %1202 = vmatpush3.bf16.msra.mxu0 %v1286_v20 }
 0x180   :  { %v291_v62 = vmul.f32 %v287_v58, %v247_v28  ;;  %1203 = vmatprep.subr.bf16.mxu0 %v1287_v21 }
 0x181   :  { %v295_v63 = vpack.c.bf16 %v293_v60, %v292_v59 }
 0x182   :  { %v294_v0 = vpack.c.bf16 %v291_v62, %v290_v61 }
 0x183   :  { %1204 = vmatpush3.bf16.msra.mxu0 %v1287_v21 }
 0x184   :  { %1185 = vmatprep.mubr.bf16.mxu1 %v294_v0 }
 0x185   :  { %1186 = vmatmul.mubr.bf16.vlgmr.msra.gmra.mrb[0].mxu1 %v295_v63 }
 0x258   :  { %v1187_v5 = vpop.f32.mrb[0].mxu1 }
 0x259   :  { %v410_v6 = vadd.f32 %v1187_v5, %v1037_v4  ;;  %v401_v7 = vpop.f32.mrb[1].mxu1 }
 0x25a   :  { %v402_v8 = vadd.f32 %v1037_v4, %v401_v7  ;;  %v1188_v9 = vpop.f32.mrb[2].mxu1 }
 0x25b   :  { %v413_v10 = vadd.f32 %v1188_v9, %v1037_v4  ;;  %v404_v11 = vpop.f32.mrb[3].mxu1  ;;  %v418_v12 = vmul.f32 %v410_v6, %v410_v6  ;;  %v1288_v9 = vld [vmem:[#allocation10] sm:$0xff]  }
 0x25c   :  { %v405_v13 = vadd.f32 %v1037_v4, %v404_v11  ;;  %v416_v14 = vmul.f32 %v402_v8, %v402_v8  ;;  %1209 = vmatprep.subr.bf16.mxu1 %v1288_v9  ;;  %v1290_v11 = vld [vmem:[#allocation10 + $0x10] sm:$0xff]  }
 0x25d   :  { %424 = vadd.xlane.f32.xlu1 %v418_v12  ;;  %v419_v15 = vmul.f32 %v413_v10, %v413_v10  ;;  %1210 = vmatpush3.bf16.msra.mxu1 %v1288_v9  ;;  %v1291_v12 = vld [vmem:[#allocation10 + $0x18] sm:$0xff]   ;;  %v1298_v9 = vld [vmem:[#allocation11 + $0x10] sm:$0xff]  }
 0x25e   :  { %420 = vadd.xlane.f32.xlu0 %v416_v14  ;;  %v417_v16 = vmul.f32 %v405_v13, %v405_v13 }
 0x261   :  { %426 = vadd.xlane.f32.xlu1 %v419_v15 }
 0x262   :  { %422 = vadd.xlane.f32.xlu0 %v417_v16 }
 0x2ea   :  { %v425_v22 = vpop.xlane.xlu1 %424 }
 0x2eb   :  { %v430_v23 = vadd.f32 1e-12, %v425_v22  ;;  %v421_v24 = vpop.xlane.xlu0 %420 }
 0x2ec   :  { %v428_v25 = vadd.f32 1e-12, %v421_v24 }
 0x2ed   :  { %1312 = vrsqrt.f32 %v430_v23 }
 0x2ee   :  { %v427_v26 = vpop.xlane.xlu1 %426  ;;  %1314 = vrsqrt.f32 %v428_v25 }
 0x2ef   :  { %v431_v27 = vadd.f32 1e-12, %v427_v26  ;;  %v423_v28 = vpop.xlane.xlu0 %422 }
 0x2f0   :  { %v429_v29 = vadd.f32 1e-12, %v423_v28 }
 0x2f1   :  { %1316 = vrsqrt.f32 %v431_v27 }
 0x2f2   :  { %1318 = vrsqrt.f32 %v429_v29 }
 0x2f7   :  { %v1313_v30 = vpop.eup %1312 }
 0x2f8   :  { %v1315_v31 = vpop.eup %1314  ;;  %v438_v37 = vmul.f32 %v1313_v30, %v410_v6 }
 0x2f9   :  { %v436_v35 = vmul.f32 %v1315_v31, %v402_v8 }
 0x2fb   :  { %v1317_v32 = vpop.eup %1316 }
 0x2fc   :  { %v1319_v33 = vpop.eup %1318  ;;  %v439_v34 = vmul.f32 %v1317_v32, %v413_v10  ;;  %v1289_v10 = vld [vmem:[#allocation10 + $0x8] sm:$0xff]  }
 0x2fd   :  { %v437_v36 = vmul.f32 %v1319_v33, %v405_v13  ;;  %1211 = vmatprep.subr.bf16.mxu1 %v1289_v10  ;;  %v1292_v13 = vld [vmem:[#allocation10 + $0x20] sm:$0xff]  }
 0x2fe   :  { %v441_v39 = vpack.c.bf16 %v439_v34, %v438_v37  ;;  %1212 = vmatpush3.bf16.msra.mxu1 %v1289_v10  ;;  %v1300_v10 = vld [vmem:[#allocation11 + $0x20] sm:$0xff]  }
 0x2ff   :  { %v440_v38 = vpack.c.bf16 %v437_v36, %v436_v35  ;;  %1213 = vmatprep.subr.bf16.mxu1 %v1290_v11 }
 0x301   :  { %1205 = vmatprep.mubr.bf16.mxu0 %v440_v38  ;;  %v1293_v38 = vld [vmem:[#allocation10 + $0x28] sm:$0xff]  }
 0x302   :  { %1206 = vmatmul.mubr.bf16.vlgmr.msra.gmra.mrb[4].mxu0 %v441_v39  ;;  %1214 = vmatpush3.bf16.msra.mxu1 %v1290_v11  ;;  %v1294_v39 = vld [vmem:[#allocation10 + $0x30] sm:$0xff]   ;;  %v1301_v11 = vld [vmem:[#allocation11 + $0x28] sm:$0xff]  }
 0x303   :  { %1215 = vmatprep.subr.bf16.mxu1 %v1291_v12 }
 0x306   :  { %1216 = vmatpush3.bf16.msra.mxu1 %v1291_v12  ;;  %v1302_v12 = vld [vmem:[#allocation11 + $0x30] sm:$0xff]  }
 0x307   :  { %1217 = vmatprep.subr.bf16.mxu1 %v1292_v13 }
 0x30a   :  { %1218 = vmatpush3.bf16.msra.mxu1 %v1292_v13  ;;  %v1303_v13 = vld [vmem:[#allocation11 + $0x38] sm:$0xff]  }
 0x30b   :  { %1219 = vmatprep.subr.bf16.mxu1 %v1293_v38 }
 0x30e   :  { %1220 = vmatpush3.bf16.msra.mxu1 %v1293_v38 }
 0x30f   :  { %1221 = vmatprep.subr.bf16.mxu1 %v1294_v39 }
 0x312   :  { %1222 = vmatpush3.bf16.msra.mxu1 %v1294_v39 }
 0x313   :  { %1223 = vmatprep.subr.bf16.mxu1 %v1295_v40 }
 0x316   :  { %1224 = vmatpush3.bf16.msra.mxu1 %v1295_v40 }
 0x3d5   :  { %v1207_v42 = vpop.f32.mrb[4].mxu0 }
 0x3d6   :  { %v540_v43 = vpop.f32.mrb[5].mxu0  ;;  %v560_v48 = vsel %vm557_vm0, %v1207_v42, -1e+30 }
 0x3d7   :  { %v1208_v44 = vpop.f32.mrb[6].mxu0  ;;  %v558_v45 = vsel %vm557_vm0, %v540_v43, -1e+30 }
 0x3d8   :  { %562 = vmax.xlane.f32.xlu0 %v558_v45  ;;  %v543_v46 = vpop.f32.mrb[7].mxu0  ;;  %v561_v49 = vsel %vm557_vm0, %v1208_v44, -1e+30 }
 0x3d9   :  { %v559_v47 = vsel %vm557_vm0, %v543_v46, -1e+30 }
 0x3da   :  { %564 = vmax.xlane.f32.xlu1 %v559_v47 }
 0x3dc   :  { %566 = vmax.xlane.f32.xlu0 %v560_v48 }
 0x3de   :  { %568 = vmax.xlane.f32.xlu1 %v561_v49 }
 0x465   :  { %v563_v50 = vpop.xlane.xlu0 %562 }
 0x466   :  { %vm570_vm1 = vcmp.ge.f32.partialorder %v558_v45, %v563_v50  ;;  %v648_v51 = vmul.f32 2.0, %v563_v50 }
 0x467   :  { %v574_v52 = vsel %vm570_vm1, %v1704_v41, 128  ;;  %v565_v53 = vpop.xlane.xlu1 %564 }
 0x468   :  { %v652_v54 = vsub.f32 2.0, %v648_v51  ;;  %vm571_vm2 = vcmp.ge.f32.partialorder %v559_v47, %v565_v53  ;;  %v649_v55 = vmul.f32 2.0, %v565_v53  ;;  %v579_v56 = vshra.s32 %v574_v52, 16 }
 0x469   :  { %v575_v57 = vsel %vm571_vm2, %v1704_v41, 128  ;;  %v567_v58 = vpop.xlane.xlu0 %566  ;;  %v578_v15 = vand.u32 65535, %v574_v52 }
 0x46a   :  { %v653_v59 = vsub.f32 2.0, %v649_v55  ;;  %vm572_vm4 = vcmp.ge.f32.partialorder %v560_v48, %v567_v58  ;;  %v581_v62 = vcvt.s32.f32 %v579_v56  ;;  %v593_v63 = vshra.s32 %v575_v57, 16 }
 0x46b   :  { %v576_v60 = vsel %vm572_vm4, %v1704_v41, 128  ;;  %v569_v61 = vpop.xlane.xlu1 %568  ;;  %v676_v0 = vsel %vm675_vm3, %v652_v54, 0.0  ;;  %v650_v14 = vmul.f32 2.0, %v567_v58  ;;  %v592_v18 = vand.u32 65535, %v575_v57 }
 0x46c   :  { %v677_v1 = vsel %vm675_vm3, %v653_v59, 0.0  ;;  %vm573_vm5 = vcmp.ge.f32.partialorder %v561_v49, %v569_v61  ;;  %582 = vmin.xlane.f32.xlu0 %v581_v62  ;;  %v595_v4 = vcvt.s32.f32 %v593_v63  ;;  %v607_v5 = vshra.s32 %v576_v60, 16 }
 0x46d   :  { %v678_v2 = vadd.f32 %v677_v1, %v676_v0  ;;  %v577_v3 = vsel %vm573_vm5, %v1704_v41, 128  ;;  %v654_v16 = vsub.f32 2.0, %v650_v14  ;;  %v651_v17 = vmul.f32 2.0, %v569_v61  ;;  %v1058_v14 = vld [vmem:[%s1759_s7] ss:$0 sm:$0xff]  ;;  %s1525_s7 = smov [#allocation14]  }
 0x46e   :  { %v621_v6 = vshra.s32 %v577_v3, 16  ;;  %596 = vmin.xlane.f32.xlu1 %v595_v4  ;;  %v609_v7 = vcvt.s32.f32 %v607_v5  ;;  %v580_v20 = vcvt.s32.f32 %v578_v15  ;;  %v606_v21 = vand.u32 65535, %v576_v60  ;;  %s1010_s5 = sshll.u32 %s1525_s7, 4  ;;  %s1011_s5 = int_to_ptr.vmem [resolvable:$true] %s1010_s5 }
 0x46f   :  { %v679_v22 = vsel %vm675_vm3, %v654_v16, 0.0  ;;  %v655_v23 = vsub.f32 2.0, %v651_v17  ;;  %v594_v26 = vcvt.s32.f32 %v592_v18  ;;  %v620_v27 = vand.u32 65535, %v577_v3  ;;  %s1460_s20 = scalar_lea.vmem %s1011_s5, 128  ;;  %p1465_p7 = scmp.lt.s32.totalorder %s1011_s5, %s1011_s5 }
 0x470   :  { %v623_v8 = vcvt.s32.f32 %v621_v6  ;;  %610 = vmin.xlane.f32.xlu0 %v609_v7  ;;  %v608_v30 = vcvt.s32.f32 %v606_v21  ;;  %v680_v31 = vadd.f32 %v679_v22, %v678_v2  ;;  %v1524_v0 = vmov 1.0|1.0   ;;  %p1461_p6 = scmp.ne.s32.totalorder %s1011_s5, %s1460_s20  ;;  %p1466_p8 = scmp.lt.s32.totalorder %s1460_s20, %s1460_s20 }
 0x471   :  { %v622_v34 = vcvt.s32.f32 %v620_v27  ;;  %v681_v35 = vsel %vm675_vm3, %v655_v23, 0.0 }
 0x472   :  { %624 = vmin.xlane.f32.xlu1 %v623_v8  ;;  %v682_v37 = vadd.f32 %v681_v35, %v680_v31  ;;  %p1467_p9 = por %p1466_p8, %p1465_p7 }
 0x474   :  { %p1468_p10 = pnand %p1467_p9, %p1461_p6 }
 0x4f9   :  { %v583_v19 = vpop.xlane.xlu0 %582 }
 0x4fa   :  { %vm584_vm6 = vcmp.eq.f32.partialorder %v581_v62, %v583_v19  ;;  %v589_v42 = vcvt.f32.s32 %v583_v19 }
 0x4fb   :  { %v597_v24 = vpop.xlane.xlu1 %596  ;;  %v585_v25 = vsel %vm584_vm6, %v580_v20, inf }
 0x4fc   :  { %586 = vmin.xlane.f32.xlu0 %v585_v25  ;;  %vm598_vm7 = vcmp.eq.f32.partialorder %v595_v4, %v597_v24  ;;  %v603_v43 = vcvt.f32.s32 %v597_v24  ;;  %v590_v45 = vshll.u32 %v589_v42, 16 }
 0x4fd   :  { %v611_v28 = vpop.xlane.xlu0 %610  ;;  %v599_v29 = vsel %vm598_vm7, %v594_v26, inf }
 0x4fe   :  { %600 = vmin.xlane.f32.xlu1 %v599_v29  ;;  %vm612_vm8 = vcmp.eq.f32.partialorder %v609_v7, %v611_v28  ;;  %v617_v46 = vcvt.f32.s32 %v611_v28  ;;  %v604_v50 = vshll.u32 %v603_v43, 16  ;;  %v1296_v7 = vld [vmem:[#allocation11] sm:$0xff]  }
 0x4ff   :  { %v625_v32 = vpop.xlane.xlu1 %624  ;;  %v613_v33 = vsel %vm612_vm8, %v608_v30, inf  ;;  %1229 = vmatprep.subr.bf16.mxu0 %v1296_v7 }
 0x500   :  { %614 = vmin.xlane.f32.xlu0 %v613_v33  ;;  %vm626_vm9 = vcmp.eq.f32.partialorder %v623_v8, %v625_v32  ;;  %v631_v48 = vcvt.f32.s32 %v625_v32  ;;  %v618_v54 = vshll.u32 %v617_v46, 16  ;;  %1230 = vmatpush3.bf16.msra.mxu0 %v1296_v7  ;;  %v1297_v8 = vld [vmem:[#allocation11 + $0x8] sm:$0xff]  }
 0x501   :  { %v627_v36 = vsel %vm626_vm9, %v622_v34, inf  ;;  %1231 = vmatprep.subr.bf16.mxu0 %v1297_v8 }
 0x502   :  { %628 = vmin.xlane.f32.xlu1 %v627_v36  ;;  %v632_v57 = vshll.u32 %v631_v48, 16 }
 0x504   :  { %683 = vadd.xlane.f32.xlu0 %v682_v37  ;;  %1232 = vmatpush3.bf16.msra.mxu0 %v1297_v8 }
 0x505   :  { %1233 = vmatprep.subr.bf16.mxu0 %v1298_v9 }
 0x508   :  { %1234 = vmatpush3.bf16.msra.mxu0 %v1298_v9 }
 0x589   :  { %v587_v44 = vpop.xlane.xlu0 %586 }
 0x58a   :  { %v588_v47 = vcvt.f32.s32 %v587_v44 }
 0x58b   :  { %v601_v49 = vpop.xlane.xlu1 %600 }
 0x58c   :  { %v591_v51 = vadd.s32 %v590_v45, %v588_v47  ;;  %v602_v52 = vcvt.f32.s32 %v601_v49 }
 0x58d   :  { %v615_v53 = vpop.xlane.xlu0 %614 }
 0x58e   :  { %v605_v55 = vadd.s32 %v604_v50, %v602_v52  ;;  %v616_v56 = vcvt.f32.s32 %v615_v53  ;;  %vm634_vm10 = vcmp.eq.s32.totalorder %v1704_v41, %v591_v51 }
 0x58f   :  { %v629_v58 = vpop.xlane.xlu1 %628 }
 0x590   :  { %v619_v59 = vadd.s32 %v618_v54, %v616_v56  ;;  %v630_v60 = vcvt.f32.s32 %v629_v58  ;;  %vm635_vm11 = vcmp.eq.s32.totalorder %v1704_v41, %v605_v55 }
 0x591   :  { %v684_v61 = vpop.xlane.xlu0 %683  ;;  %vm1067_vm12 = vmpackc.low %vm635_vm11, %vm634_vm10 }
 0x592   :  { %v633_v62 = vadd.s32 %v632_v57, %v630_v60  ;;  %v685_v63 = vrot.slane %v684_v61, 4  ;;  %1225 = vmatprep.mubr.msk.bf16.mxu1 %vm1067_vm12, %v1524_v0  ;;  %vm636_vm13 = vcmp.eq.s32.totalorder %v1704_v41, %v619_v59 }
 0x594   :  { %vm637_vm14 = vcmp.eq.s32.totalorder %v1704_v41, %v633_v62  ;;  %v686_v1 = vadd.f32 %v685_v63, %v684_v61  ;;  %v1299_v41 = vld [vmem:[#allocation11 + $0x18] sm:$0xff]  }
 0x595   :  { %vm1069_vm15 = vmpackc.low %vm637_vm14, %vm636_vm13  ;;  %1235 = vmatprep.subr.bf16.mxu0 %v1299_v41 }
 0x596   :  { %v687_v2 = vrot.slane %v686_v1, 2  ;;  %1226 = vmatmul.mubr.msk.bf16.vlgmr.msra.gmra.mrb[4].mxu1 %vm1069_vm15, %v1524_v0  ;;  %1236 = vmatpush3.bf16.msra.mxu0 %v1299_v41 }
 0x597   :  { %1237 = vmatprep.subr.bf16.mxu0 %v1300_v10 }
 0x598   :  { %v688_v3 = vadd.f32 %v687_v2, %v686_v1 }
 0x59a   :  { %v689_v4 = vrot.slane %v688_v3, 1  ;;  %1238 = vmatpush3.bf16.msra.mxu0 %v1300_v10 }
 0x59b   :  { %1239 = vmatprep.subr.bf16.mxu0 %v1301_v11 }
 0x59c   :  { %v690_v5 = vadd.f32 %v689_v4, %v688_v3 }
 0x59e   :  { %1249 = vpush %v690_v5  ;;  %1240 = vmatpush3.bf16.msra.mxu0 %v1301_v11 }
 0x59f   :  { %1241 = vmatprep.subr.bf16.mxu0 %v1302_v12 }
 0x5a2   :  { %1242 = vmatpush3.bf16.msra.mxu0 %v1302_v12 }
 0x5a3   :  { %1243 = vmatprep.subr.bf16.mxu0 %v1303_v13 }
 0x5a6   :  { %1244 = vmatpush3.bf16.msra.mxu0 %v1303_v13 }
 0x5cf   :  { %s1250_s4 = spop %1249 }
 0x5d0   :  { %v692_v6 = vstv %s1250_s4 }
 0x5d1   :  { %693 = vst [vmem:[#allocation14] sm:$0xff] %v692_v6 }
 0x669   :  { %v1227_v15 = vpop.f32.mrb[4].mxu1 }
 0x66a   :  { %v808_v16 = vadd.f32 %v1227_v15, %v1058_v14  ;;  %v799_v17 = vpop.f32.mrb[5].mxu1 }
 0x66b   :  { %v800_v18 = vadd.f32 %v1058_v14, %v799_v17  ;;  %v1228_v19 = vpop.f32.mrb[6].mxu1 }
 0x66c   :  { %v816_v20 = vmul.f32 %v808_v16, %v808_v16  ;;  %v811_v21 = vadd.f32 %v1228_v19, %v1058_v14  ;;  %v802_v22 = vpop.f32.mrb[7].mxu1 }
 0x66d   :  { %v814_v23 = vmul.f32 %v800_v18, %v800_v18  ;;  %v803_v24 = vadd.f32 %v1058_v14, %v802_v22 }
 0x66e   :  { %v820_v25 = vmul.f32 %v816_v20, %v808_v16  ;;  %v817_v26 = vmul.f32 %v811_v21, %v811_v21 }
 0x66f   :  { %v818_v27 = vmul.f32 %v814_v23, %v800_v18  ;;  %v815_v28 = vmul.f32 %v803_v24, %v803_v24 }
 0x670   :  { %v824_v29 = vmul.f32 0.044715, %v820_v25  ;;  %v821_v30 = vmul.f32 %v817_v26, %v811_v21 }
 0x671   :  { %v822_v31 = vmul.f32 0.044715, %v818_v27  ;;  %v819_v32 = vmul.f32 %v815_v28, %v803_v24 }
 0x672   :  { %v828_v33 = vadd.f32 %v824_v29, %v808_v16  ;;  %v825_v34 = vmul.f32 0.044715, %v821_v30 }
 0x673   :  { %v826_v35 = vadd.f32 %v822_v31, %v800_v18  ;;  %v823_v36 = vmul.f32 0.044715, %v819_v32 }
 0x674   :  { %v832_v37 = vmul.f32 0.7978846, %v828_v33  ;;  %v829_v38 = vadd.f32 %v825_v34, %v811_v21 }
 0x675   :  { %v830_v39 = vmul.f32 0.7978846, %v826_v35  ;;  %v827_v40 = vadd.f32 %v823_v36, %v803_v24 }
 0x676   :  { %1320 = vtanh.f32 %v832_v37  ;;  %v833_v42 = vmul.f32 0.7978846, %v829_v38 }
 0x677   :  { %1322 = vtanh.f32 %v830_v39  ;;  %v831_v43 = vmul.f32 0.7978846, %v827_v40 }
 0x678   :  { %1324 = vtanh.f32 %v833_v42 }
 0x679   :  { %1326 = vtanh.f32 %v831_v43 }
 0x680   :  { %v1321_v44 = vpop.eup %1320 }
 0x681   :  { %v1323_v45 = vpop.eup %1322  ;;  %v840_v46 = vadd.f32 1.0, %v1321_v44 }
 0x682   :  { %v1325_v47 = vpop.eup %1324  ;;  %v838_v48 = vadd.f32 1.0, %v1323_v45 }
 0x683   :  { %v1327_v49 = vpop.eup %1326  ;;  %v844_v50 = vmul.f32 0.5, %v840_v46  ;;  %v841_v51 = vadd.f32 1.0, %v1325_v47 }
 0x684   :  { %v839_v52 = vadd.f32 1.0, %v1327_v49  ;;  %v842_v53 = vmul.f32 0.5, %v838_v48 }
 0x685   :  { %v845_v54 = vmul.f32 0.5, %v841_v51  ;;  %v848_v56 = vmul.f32 %v844_v50, %v808_v16 }
 0x686   :  { %v843_v55 = vmul.f32 0.5, %v839_v52  ;;  %v846_v58 = vmul.f32 %v842_v53, %v800_v18 }
 0x687   :  { %v849_v57 = vmul.f32 %v845_v54, %v811_v21 }
 0x688   :  { %v847_v59 = vmul.f32 %v843_v55, %v803_v24 }
 0x689   :  { %v851_v60 = vpack.c.bf16 %v849_v57, %v848_v56 }
 0x68a   :  { %v850_v61 = vpack.c.bf16 %v847_v59, %v846_v58 }
 0x68c   :  { %1245 = vmatprep.mubr.bf16.mxu0 %v850_v61 }
 0x68d   :  { %1246 = vmatmul.mubr.bf16.vlgmr.msra.gmra.mrb[8].mxu0 %v851_v60 }
 0x68e   :  { %1471 = shalt.err (!%p1468_p10)
}
 0x68f   :  { %s1472_s22 = scalar_lea.hbm %s1763_s11, 128 }
 0x690   :  { %p1473_p11 = scmp.ne.s32.totalorder %s1763_s11, %s1472_s22  ;;  %p1476_p12 = scmp.lt.u32.totalorder %s1472_s22, %s1763_s11 }
 0x692   :  { %p1478_p13 = pnand %p1476_p12, %p1473_p11 }
 0x694   :  { %1481 = shalt.err (!%p1478_p13)
}
 0x695   :  { %1013 = dma.vmem_to_hbm [thread:$0]  %s1011_s5, 128, %s1763_s11, [#allocation15]   ;;  %v1071_v63 = vld [vmem:[%s1761_s9] ss:$0 sm:$0xff] }
 0x696   :  { %s1526_s0 = smov [#allocation13]  }
 0x697   :  { %s997_s25 = sshll.u32 %s1526_s0, 4  ;;  %s998_s25 = int_to_ptr.vmem [resolvable:$true] %s997_s25 }
 0x698   :  { %s1482_s11 = scalar_lea.vmem %s998_s25, 256  ;;  %p1487_p1 = scmp.lt.s32.totalorder %s998_s25, %s998_s25 }
 0x699   :  { %p1483_p0 = scmp.ne.s32.totalorder %s998_s25, %s1482_s11  ;;  %p1488_p2 = scmp.lt.s32.totalorder %s1482_s11, %s1482_s11 }
 0x69b   :  { %p1489_p3 = por %p1488_p2, %p1487_p1 }
 0x69d   :  { %p1490_p4 = pnand %p1489_p3, %p1483_p0 }
 0x760   :  { %v1247_v62 = vpop.f32.mrb[8].mxu0 }
 0x761   :  { %v957_v0 = vpop.f32.mrb[9].mxu0  ;;  %v966_v2 = vadd.f32 %v1247_v62, %v1071_v63 }
 0x762   :  { %v1248_v1 = vpop.f32.mrb[10].mxu0  ;;  %v958_v5 = vadd.f32 %v1071_v63, %v957_v0 }
 0x763   :  { %v969_v3 = vadd.f32 %v1248_v1, %v1071_v63  ;;  %v960_v4 = vpop.f32.mrb[11].mxu0 }
 0x764   :  { %v961_v6 = vadd.f32 %v1071_v63, %v960_v4 }
 0x765   :  { %v1096_v7 = vpack.c.bf16 %v969_v3, %v966_v2 }
 0x766   :  { %v1091_v8 = vpack.c.bf16 %v961_v6, %v958_v5 }
 0x767   :  { %1098 = vst [vmem:[#allocation13 + $0x8] sm:$0xff] %v1096_v7  }
 0x768   :  { %1092 = vst [vmem:[#allocation13] sm:$0xff] %v1091_v8  }
 0x769   :  { %1493 = shalt.err (!%p1490_p4)
}
 0x76a   :  { %s1494_s6 = scalar_lea.hbm %s1762_s10, 256 }
 0x76b   :  { %p1495_p5 = scmp.ne.s32.totalorder %s1762_s10, %s1494_s6  ;;  %p1498_p6 = scmp.lt.u32.totalorder %s1494_s6, %s1762_s10 }
 0x76d   :  { %p1500_p7 = pnand %p1498_p6, %p1495_p5 }
 0x76f   :  { %1503 = shalt.err (!%p1500_p7)
}
 0x770   :  { %1003 = dma.vmem_to_hbm [thread:$0]  %s998_s25, 256, %s1762_s10, [#allocation4], %s1518_s29, %s1518_s29, %s1519_s30  }
 0x771   :  { %1512 = dma.done.wait [#allocation4], 256  }
 0x772   :  { %1513 = vsyncadd [#allocation4], 4294967040 }
 0x773   :  { %1514 = dma.done.wait [#allocation15], 128  }
 0x774   :  { %1515 = vsyncadd [#allocation15], 4294967168 }
 0x775   :  { %1020 = vsyncpa [#allocation3], 1 }
 0x776   :  { %1021 = vsyncpa [#allocation6], 1 }
 0x777   :  { %1022 = vsyncpa [#allocation9], 1 }
 0x778   :  { %1023 = vsyncpa [#allocation12], 1 }
 0x779   :  { %1024 = vsyncpa [#allocation4], 1 }
 0x77a   :  { %1025 = vsyncpa [#allocation15], 1 }

</bundles_post_ra>
